<compile_context>
chip_gen: v7x
topology: tpu7x:2x2x1
jax: 0.10.0
libtpu: 0.0.40
codegen_flags: <defaults>
</compile_context>

<pallas_src>
import numpy as np
import jax
import jax.numpy as jnp
from jax.experimental import pallas as pl
from jax.experimental.pallas import tpu as pltpu

BN_EPS = 1e-5
LEAKY_SLOPE = 0.1
LANE = 128
SUBLANE = 8
NEG_BIG = -1e30  # large finite negative bias for padded output logits (not -inf)


def _round_up(n, m):
    return (n + m - 1) // m * m


def _cdiv(a, b):
    return -(-a // b)


def _leaky_relu(x, slope=LEAKY_SLOPE):
    # max(x, slope*x) == LeakyReLU(slope) for 0 < slope < 1; mul+max on the VPU.
    return jnp.maximum(x, slope * x)


def dense_torch_kernel(x_ref, w1_ref, b1_ref, w2_ref, b2_ref, w3_ref, b3_ref,
                       o_ref, acc_ref):
    """Fused MLP forward for one (batch tile, K tile) grid point.

    Layer-1 matmul is accumulated over the K (n_input) grid axis into acc_ref;
    layers 2/3 + softmax run once per batch tile on the last K step.
    Eval-mode BatchNorm scale is folded into w2/w3; dropout is identity in eval.
    """
    k = pl.program_id(1)

    @pl.when(k == 0)
    def _():
        acc_ref[...] = jnp.zeros_like(acc_ref)

    acc_ref[...] += jnp.dot(x_ref[...], w1_ref[...],
                            preferred_element_type=jnp.float32)

    @pl.when(k == pl.num_programs(1) - 1)
    def _():
        # Layer 1 epilogue: bias + LeakyReLU (BN scale folded into w2).
        h = _leaky_relu(acc_ref[...] + b1_ref[...]).astype(w2_ref.dtype)

        # Layer 2: Linear -> LeakyReLU (BN scale folded into w3).
        h = jnp.dot(h, w2_ref[...], preferred_element_type=jnp.float32) + b2_ref[...]
        h = _leaky_relu(h).astype(w3_ref.dtype)

        # Output layer: Linear -> Softmax over the full 128 lanes.
        # Padded logits carry a -1e30 bias -> exp underflows to exactly 0.
        logits = jnp.dot(h, w3_ref[...], preferred_element_type=jnp.float32) + b3_ref[...]
        m = jnp.max(logits, axis=1, keepdims=True)
        e = jnp.exp(logits - m)
        o_ref[...] = e / jnp.sum(e, axis=1, keepdims=True)   # exact division


def prep_params(params, compute_dtype=jnp.float32):
    """Fold eval-mode BatchNorm scale into downstream weights; pad to lane multiples.

    Zero padding is numerically inert (leaky(0)=0, zero rows/cols add nothing to the
    next matmul); padded *output* logits get a -1e30 bias so softmax ignores them.
    Pass compute_dtype=jnp.bfloat16 (and feed bf16 x) for the halved HBM stream on
    v6e/v7x; biases stay f32.
    """
    w1, b1, w2, b2, w3, b3 = params
    bn_scale = jnp.float32(1.0 / np.sqrt(1.0 + BN_EPS))
    n_in, h1 = w1.shape
    h2 = w2.shape[1]
    n_out = w3.shape[1]
    Nin = _round_up(n_in, LANE)
    H1, H2 = _round_up(h1, LANE), _round_up(h2, LANE)
    Nout = _round_up(n_out, LANE)

    # Fold BN(eval, fresh stats) scale of layer-1/-2 outputs into the *next* layer's
    # weights using LeakyReLU positive homogeneity: (leaky(z)*s) @ W == leaky(z) @ (s*W).
    w2 = w2 * bn_scale
    w3 = w3 * bn_scale

    w1p = jnp.pad(w1, ((0, Nin - n_in), (0, H1 - h1))).astype(compute_dtype)
    b1p = jnp.pad(b1, ((0, 0), (0, H1 - h1))).astype(jnp.float32)
    w2p = jnp.pad(w2, ((0, H1 - h1), (0, H2 - h2))).astype(compute_dtype)
    b2p = jnp.pad(b2, ((0, 0), (0, H2 - h2))).astype(jnp.float32)
    w3p = jnp.pad(w3, ((0, H2 - h2), (0, Nout - n_out))).astype(compute_dtype)
    b3p = jnp.pad(b3, ((0, 0), (0, Nout - n_out)),
                  constant_values=NEG_BIG).astype(jnp.float32)
    return (w1p, b1p, w2p, b2p, w3p, b3p)


def _vmem_budget_bytes():
    """Chip-aware (tile budget, vmem_limit_bytes)."""
    try:
        cap = int(pltpu.get_tpu_info().vmem_capacity_bytes)
    except Exception:
        cap = 64 * 1024 * 1024  # conservative: v7x per-TensorCore VMEM
    if cap >= 100 * 1024 * 1024:
        # v5e / v6e: 128 MiB physical VMEM -> large batch tiles, raised scoped limit.
        return 64 * 1024 * 1024, 96 * 1024 * 1024
    # v7x: 64 MiB physical per TensorCore; leave headroom for compiler scratch.
    return 36 * 1024 * 1024, 52 * 1024 * 1024


def dense_torch_forward(x, prepped_params, n_out, *, tb_max=1024, max_tk=None):
    """x: [B, n_input] (already in the compute dtype; no wrapper-side cast is done).

    prepped_params: output of prep_params(). n_out: true (unpadded) number of labels.
    max_tk: optional cap (multiple of 128) on the K tile, mainly for testing.
    """
    w1, b1, w2, b2, w3, b3 = prepped_params
    B, n_in = x.shape
    n_in_p, H1 = w1.shape
    H2 = w2.shape[1]
    n_out_p = w3.shape[1]
    assert n_in <= n_in_p

    in_bytes = x.dtype.itemsize
    w_bytes = w1.dtype.itemsize
    budget, vmem_limit = _vmem_budget_bytes()

    # ---- K (n_input) tiling: stream w1 when it cannot stay comfortably resident ----
    k_budget = max(budget // 4, 2 * LANE * H1 * w_bytes)
    if max_tk is not None:
        k_budget = min(k_budget, 2 * int(max_tk) * H1 * w_bytes)
    if 2 * n_in_p * H1 * w_bytes <= k_budget:
        tk = n_in_p
    else:
        num_k = _cdiv(2 * n_in_p * H1 * w_bytes, k_budget)
        tk = _round_up(_cdiv(n_in_p, num_k), LANE)
    num_k = _cdiv(n_in_p, tk)
    n_in_pp = tk * num_k                     # pad K so every K tile is full

    # ---- VMEM accounting: double-buffered tiles + resident operands + intermediates ----
    other_bytes = 2 * (int(np.prod(w2.shape)) * w_bytes
                       + int(np.prod(w3.shape)) * w_bytes
                       + (int(np.prod(b1.shape)) + int(np.prod(b2.shape))
                          + int(np.prod(b3.shape))) * 4)

    def tile_bytes(t):
        return (2 * t * tk * in_bytes            # x K-block, double-buffered
                + 2 * t * n_out_p * 4            # output tile, double-buffered
                + 2 * tk * H1 * w_bytes          # w1 K-block, double-buffered
                + other_bytes                    # resident weights/biases (2 bufs each)
                + t * (2 * H1 + H2 + n_out_p) * 4)  # acc scratch + live f32 intermediates

    # ---- Batch tile: biggest multiple of the sublane packing that fits the budget ----
    tile_min = max(SUBLANE, 32 // in_bytes)      # 8 for f32, 16 for bf16
    tb = max(tile_min, min(tb_max, _round_up(B, tile_min)))
    tb = _round_up(tb, tile_min)
    while tb > tile_min and tile_bytes(tb) > budget:
        tb = max(tile_min, _round_up(tb // 2, tile_min))
    # Guarantee >= 2 batch tiles when the batch allows, so "parallel" can split the
    # grid across v7x's two TensorCores (megacore).
    if B >= 2 * tile_min:
        tb = min(tb, _round_up(_cdiv(B, 2), tile_min))
    tb = max(tile_min, tb)

    Bp = _round_up(B, tb)
    n_bt = Bp // tb

    # ---- Padding (single pad op for x; w1 only if extra K padding is needed) ----
    pad_rows, pad_cols = Bp - B, n_in_pp - n_in
    if pad_rows or pad_cols:
        x = jnp.pad(x, ((0, pad_rows), (0, pad_cols)))
    if n_in_pp != n_in_p:
        w1 = jnp.pad(w1, ((0, n_in_pp - n_in_p), (0, 0)))

    grid = (n_bt, num_k)

    cost = pl.CostEstimate(
        flops=2 * Bp * (n_in_pp * H1 + H1 * H2 + H2 * n_out_p),
        transcendentals=Bp * n_out_p,
        bytes_accessed=(Bp * n_in_pp * in_bytes + Bp * n_out_p * 4
                        + (n_bt if num_k > 1 else 1) * n_in_pp * H1 * w_bytes
                        + other_bytes // 2),
    )

    out = pl.pallas_call(
        dense_torch_kernel,
        out_shape=jax.ShapeDtypeStruct((Bp, n_out_p), jnp.float32),
        grid=grid,
        in_specs=[
            pl.BlockSpec((tb, tk), lambda i, k: (i, k)),     # x: streamed per (batch, K) tile
            pl.BlockSpec((tk, H1), lambda i, k: (k, 0)),      # w1: streamed per K tile
            pl.BlockSpec(b1.shape, lambda i, k: (0, 0)),      # small operands: VMEM-resident
            pl.BlockSpec(w2.shape, lambda i, k: (0, 0)),
            pl.BlockSpec(b2.shape, lambda i, k: (0, 0)),
            pl.BlockSpec(w3.shape, lambda i, k: (0, 0)),
            pl.BlockSpec(b3.shape, lambda i, k: (0, 0)),
        ],
        out_specs=pl.BlockSpec((tb, n_out_p), lambda i, k: (i, 0)),
        scratch_shapes=[pltpu.VMEM((tb, H1), jnp.float32)],   # layer-1 accumulator
        compiler_params=pltpu.CompilerParams(
            dimension_semantics=("parallel", "arbitrary"),
            vmem_limit_bytes=int(vmem_limit),
        ),
        cost_estimate=cost,
    )(x, w1, b1, w2, b2, w3, b3)
    return out[:B, :n_out]


def xavier_uniform(key, fan_in, fan_out, gain):
    """torch.nn.init.xavier_uniform_ equivalent; returns [fan_in, fan_out] (transposed layout)."""
    bound = gain * np.sqrt(6.0 / (fan_in + fan_out))
    return jax.random.uniform(
        key, (fan_in, fan_out), dtype=jnp.float32, minval=-bound, maxval=bound
    )


def init_params(key, n_input, hidden_layers, n_output):
    # gain = calculate_gain('leaky_relu', 0.1) = sqrt(2 / (1 + 0.1^2))
    gain = np.sqrt(2.0 / (1.0 + LEAKY_SLOPE ** 2))
    layer_sizes = [n_input] + list(hidden_layers) + [n_output]
    params = []
    keys = jax.random.split(key, len(layer_sizes) - 1)
    for i in range(len(layer_sizes) - 1):
        fan_in, fan_out = layer_sizes[i], layer_sizes[i + 1]
        w = xavier_uniform(keys[i], fan_in, fan_out, gain)
        b = jnp.zeros((1, fan_out), dtype=jnp.float32)  # torch.nn.init.zeros_(bias)
        params.extend([w, b])
    return tuple(params)


def reference_forward(x, params):
    """Pure-JAX reference of the same eval-mode forward (unfolded, unpadded params)."""
    w1, b1, w2, b2, w3, b3 = params
    bn_scale = 1.0 / np.sqrt(1.0 + BN_EPS)
    h = jnp.maximum(x @ w1 + b1, LEAKY_SLOPE * (x @ w1 + b1)) * bn_scale
    h = jnp.maximum(h @ w2 + b2, LEAKY_SLOPE * (h @ w2 + b2)) * bn_scale
    logits = h @ w3 + b3
    return jax.nn.softmax(logits, axis=1)


if __name__ == "__main__":
    key = jax.random.PRNGKey(0)
    k_x1, k_p1, k_x2, k_p2 = jax.random.split(key, 4)
    hidden_layers = [64, 64]

    # --- Test 1: module-default small shapes (single K tile, single batch tile) ---
    batch1, n_input1, n_output1 = 8, 32, 8
    x1 = jax.random.normal(k_x1, (batch1, n_input1), dtype=jnp.float32)
    params1 = init_params(k_p1, n_input1, hidden_layers, n_output1)
    prepped1 = prep_params(params1, compute_dtype=jnp.float32)
    out1 = jax.block_until_ready(dense_torch_forward(x1, prepped1, n_output1))
    ref1 = reference_forward(x1, params1)
    np.testing.assert_allclose(np.asarray(out1), np.asarray(ref1), rtol=2e-3, atol=2e-4)
    np.testing.assert_allclose(np.asarray(out1).sum(axis=1), np.ones(batch1),
                               rtol=1e-3, atol=1e-3)
    assert np.array_equal(np.argmax(np.asarray(out1), axis=1),
                          np.argmax(np.asarray(ref1), axis=1))

    # --- Test 2: exercises K-tiling (streamed w1), multiple batch tiles and batch padding ---
    batch2, n_input2, n_output2 = 52, 384, 10
    x2 = jax.random.normal(k_x2, (batch2, n_input2), dtype=jnp.float32)
    params2 = init_params(k_p2, n_input2, hidden_layers, n_output2)
    prepped2 = prep_params(params2, compute_dtype=jnp.float32)
    out2 = jax.block_until_ready(
        dense_torch_forward(x2, prepped2, n_output2, max_tk=128))
    ref2 = reference_forward(x2, params2)
    np.testing.assert_allclose(np.asarray(out2), np.asarray(ref2), rtol=5e-3, atol=5e-4)
    np.testing.assert_allclose(np.asarray(out2).sum(axis=1), np.ones(batch2),
                               rtol=1e-3, atol=1e-3)
    assert np.array_equal(np.argmax(np.asarray(out2), axis=1),
                          np.argmax(np.asarray(ref2), axis=1))

    print("KERNEL_OK")
</pallas_src>

<mosaic_0001>
module attributes {stable_mosaic.version = 11 : i64} {
  func.func @dense_torch_kernel(%arg0: i32, %arg1: i32, %arg2: memref<8x128xf32, #tpu.memory_space<vmem>>, %arg3: memref<128x128xf32, #tpu.memory_space<vmem>>, %arg4: memref<1x128xf32, #tpu.memory_space<vmem>>, %arg5: memref<128x128xf32, #tpu.memory_space<vmem>>, %arg6: memref<1x128xf32, #tpu.memory_space<vmem>>, %arg7: memref<128x128xf32, #tpu.memory_space<vmem>>, %arg8: memref<1x128xf32, #tpu.memory_space<vmem>>, %arg9: memref<8x128xf32, #tpu.memory_space<vmem>>, %arg10: memref<8x128xf32, #tpu.memory_space<vmem>>) attributes {dimension_semantics = [#tpu.dimension_semantics<parallel>, #tpu.dimension_semantics<arbitrary>], iteration_bounds = array<i64: 1, 1>, scalar_prefetch = 0 : i64, scratch_operands = 1 : i64, tpu.core_type = #tpu.core_type<tc>, window_params = [{transform_indices = @transform_0, window_bounds = array<i64: 8, 128>}, {transform_indices = @transform_1, window_bounds = array<i64: 128, 128>}, {pipeline_mode = #tpu.pipeline_mode<synchronous>, transform_indices = @transform_2, window_bounds = array<i64: 1, 128>}, {pipeline_mode = #tpu.pipeline_mode<synchronous>, transform_indices = @transform_3, window_bounds = array<i64: 128, 128>}, {pipeline_mode = #tpu.pipeline_mode<synchronous>, transform_indices = @transform_4, window_bounds = array<i64: 1, 128>}, {pipeline_mode = #tpu.pipeline_mode<synchronous>, transform_indices = @transform_5, window_bounds = array<i64: 128, 128>}, {pipeline_mode = #tpu.pipeline_mode<synchronous>, transform_indices = @transform_6, window_bounds = array<i64: 1, 128>}, {transform_indices = @transform_7, window_bounds = array<i64: 8, 128>}]} {
    %c0_i32 = arith.constant 0 : i32
    %0 = arith.cmpi eq, %arg1, %c0_i32 : i32
    %1 = arith.extui %0 : i1 to i32
    %c0_i32_0 = arith.constant 0 : i32
    %2 = arith.cmpi ne, %1, %c0_i32_0 : i32
    scf.if %2 {
      %cst_10 = arith.constant 0.000000e+00 : f32
      %12 = vector.broadcast %cst_10 : f32 to vector<8x128xf32>
      %c0_11 = arith.constant 0 : index
      %c0_12 = arith.constant 0 : index
      %13 = vector.load %arg10[%c0_11, %c0_12] : memref<8x128xf32, #tpu.memory_space<vmem>>, vector<8x128xf32>
      tpu.vector_store %arg10[%c0_11, %c0_12], %12 {strides = array<i32>} : memref<8x128xf32, #tpu.memory_space<vmem>>, vector<8x128xf32>,
    } else {
    }
    %c0 = arith.constant 0 : index
    %c0_1 = arith.constant 0 : index
    %3 = vector.load %arg10[%c0, %c0_1] : memref<8x128xf32, #tpu.memory_space<vmem>>, vector<8x128xf32>
    %c0_2 = arith.constant 0 : index
    %c0_3 = arith.constant 0 : index
    %4 = vector.load %arg2[%c0_2, %c0_3] : memref<8x128xf32, #tpu.memory_space<vmem>>, vector<8x128xf32>
    %c0_4 = arith.constant 0 : index
    %c0_5 = arith.constant 0 : index
    %5 = vector.load %arg3[%c0_4, %c0_5] : memref<128x128xf32, #tpu.memory_space<vmem>>, vector<128x128xf32>
    %cst = arith.constant dense<0.000000e+00> : vector<8x128xf32>
    %6 = tpu.matmul %4, %5, %cst {dimension_numbers = #tpu.dot_dimension_numbers<[1], [0], [0], [1], [0, 0, 1, 1], [], []>} : vector<8x128xf32>, vector<128x128xf32>, vector<8x128xf32> -> vector<8x128xf32>
    %7 = arith.addf %3, %6 : vector<8x128xf32>
    %c0_6 = arith.constant 0 : index
    %c0_7 = arith.constant 0 : index
    %8 = vector.load %arg10[%c0_6, %c0_7] : memref<8x128xf32, #tpu.memory_space<vmem>>, vector<8x128xf32>
    tpu.vector_store %arg10[%c0_6, %c0_7], %7 {strides = array<i32>} : memref<8x128xf32, #tpu.memory_space<vmem>>, vector<8x128xf32>,
    %c0_i32_8 = arith.constant 0 : i32
    %9 = arith.cmpi eq, %arg1, %c0_i32_8 : i32
    %10 = arith.extui %9 : i1 to i32
    %c0_i32_9 = arith.constant 0 : i32
    %11 = arith.cmpi ne, %10, %c0_i32_9 : i32
    scf.if %11 {
      %c0_10 = arith.constant 0 : index
      %c0_11 = arith.constant 0 : index
      %12 = vector.load %arg10[%c0_10, %c0_11] : memref<8x128xf32, #tpu.memory_space<vmem>>, vector<8x128xf32>
      %c0_12 = arith.constant 0 : index
      %c0_13 = arith.constant 0 : index
      %13 = vector.load %arg4[%c0_12, %c0_13] : memref<1x128xf32, #tpu.memory_space<vmem>>, vector<1x128xf32>
      %14 = vector.broadcast %13 : vector<1x128xf32> to vector<8x128xf32>
      %15 = arith.addf %12, %14 : vector<8x128xf32>
      %cst_14 = arith.constant 1.000000e-01 : f32
      %16 = vector.broadcast %cst_14 : f32 to vector<8x128xf32>
      %17 = arith.mulf %16, %15 : vector<8x128xf32>
      %18 = arith.maximumf %15, %17 : vector<8x128xf32>
      %c0_15 = arith.constant 0 : index
      %c0_16 = arith.constant 0 : index
      %19 = vector.load %arg5[%c0_15, %c0_16] : memref<128x128xf32, #tpu.memory_space<vmem>>, vector<128x128xf32>
      %cst_17 = arith.constant dense<0.000000e+00> : vector<8x128xf32>
      %20 = tpu.matmul %18, %19, %cst_17 {dimension_numbers = #tpu.dot_dimension_numbers<[1], [0], [0], [1], [0, 0, 1, 1], [], []>} : vector<8x128xf32>, vector<128x128xf32>, vector<8x128xf32> -> vector<8x128xf32>
      %c0_18 = arith.constant 0 : index
      %c0_19 = arith.constant 0 : index
      %21 = vector.load %arg6[%c0_18, %c0_19] : memref<1x128xf32, #tpu.memory_space<vmem>>, vector<1x128xf32>
      %22 = vector.broadcast %21 : vector<1x128xf32> to vector<8x128xf32>
      %23 = arith.addf %20, %22 : vector<8x128xf32>
      %cst_20 = arith.constant 1.000000e-01 : f32
      %24 = vector.broadcast %cst_20 : f32 to vector<8x128xf32>
      %25 = arith.mulf %24, %23 : vector<8x128xf32>
      %26 = arith.maximumf %23, %25 : vector<8x128xf32>
      %c0_21 = arith.constant 0 : index
      %c0_22 = arith.constant 0 : index
      %27 = vector.load %arg7[%c0_21, %c0_22] : memref<128x128xf32, #tpu.memory_space<vmem>>, vector<128x128xf32>
      %cst_23 = arith.constant dense<0.000000e+00> : vector<8x128xf32>
      %28 = tpu.matmul %26, %27, %cst_23 {dimension_numbers = #tpu.dot_dimension_numbers<[1], [0], [0], [1], [0, 0, 1, 1], [], []>} : vector<8x128xf32>, vector<128x128xf32>, vector<8x128xf32> -> vector<8x128xf32>
      %c0_24 = arith.constant 0 : index
      %c0_25 = arith.constant 0 : index
      %29 = vector.load %arg8[%c0_24, %c0_25] : memref<1x128xf32, #tpu.memory_space<vmem>>, vector<1x128xf32>
      %30 = vector.broadcast %29 : vector<1x128xf32> to vector<8x128xf32>
      %31 = arith.addf %28, %30 : vector<8x128xf32>
      %cst_26 = arith.constant dense<0xFF800000> : vector<8xf32>
      %32 = vector.multi_reduction <maximumf>, %31, %cst_26 [1] : vector<8x128xf32> to vector<8xf32>
      %33 = vector.shape_cast %32 : vector<8xf32> to vector<8x1xf32>
      %34 = vector.broadcast %33 : vector<8x1xf32> to vector<8x128xf32>
      %35 = arith.subf %31, %34 : vector<8x128xf32>
      %36 = math.exp %35 : vector<8x128xf32>
      %cst_27 = arith.constant dense<0.000000e+00> : vector<8xf32>
      %37 = vector.multi_reduction <add>, %36, %cst_27 [1] : vector<8x128xf32> to vector<8xf32>
      %38 = vector.shape_cast %37 : vector<8xf32> to vector<8x1xf32>
      %39 = vector.broadcast %38 : vector<8x1xf32> to vector<8x128xf32>
      %40 = arith.divf %36, %39 : vector<8x128xf32>
      %c0_28 = arith.constant 0 : index
      %c0_29 = arith.constant 0 : index
      %41 = vector.load %arg9[%c0_28, %c0_29] : memref<8x128xf32, #tpu.memory_space<vmem>>, vector<8x128xf32>
      tpu.vector_store %arg9[%c0_28, %c0_29], %40 {strides = array<i32>} : memref<8x128xf32, #tpu.memory_space<vmem>>, vector<8x128xf32>,
    } else {
    }
    return
  }
  func.func @transform_0(%arg0: i32, %arg1: i32) -> (i32, i32) {
    %c0_i32 = arith.constant 0 : i32
    return %arg0, %arg1 : i32, i32
  }
  func.func @transform_1(%arg0: i32, %arg1: i32) -> (i32, i32) {
    %c0_i32 = arith.constant 0 : i32
    %c0_i32_0 = arith.constant 0 : i32
    return %arg1, %c0_i32 : i32, i32
  }
  func.func @transform_2(%arg0: i32, %arg1: i32) -> (i32, i32) {
    %c0_i32 = arith.constant 0 : i32
    %c0_i32_0 = arith.constant 0 : i32
    %c0_i32_1 = arith.constant 0 : i32
    return %c0_i32, %c0_i32_0 : i32, i32
  }
  func.func @transform_3(%arg0: i32, %arg1: i32) -> (i32, i32) {
    %c0_i32 = arith.constant 0 : i32
    %c0_i32_0 = arith.constant 0 : i32
    %c0_i32_1 = arith.constant 0 : i32
    return %c0_i32, %c0_i32_0 : i32, i32
  }
  func.func @transform_4(%arg0: i32, %arg1: i32) -> (i32, i32) {
    %c0_i32 = arith.constant 0 : i32
    %c0_i32_0 = arith.constant 0 : i32
    %c0_i32_1 = arith.constant 0 : i32
    return %c0_i32, %c0_i32_0 : i32, i32
  }
  func.func @transform_5(%arg0: i32, %arg1: i32) -> (i32, i32) {
    %c0_i32 = arith.constant 0 : i32
    %c0_i32_0 = arith.constant 0 : i32
    %c0_i32_1 = arith.constant 0 : i32
    return %c0_i32, %c0_i32_0 : i32, i32
  }
  func.func @transform_6(%arg0: i32, %arg1: i32) -> (i32, i32) {
    %c0_i32 = arith.constant 0 : i32
    %c0_i32_0 = arith.constant 0 : i32
    %c0_i32_1 = arith.constant 0 : i32
    return %c0_i32, %c0_i32_0 : i32, i32
  }
  func.func @transform_7(%arg0: i32, %arg1: i32) -> (i32, i32) {
    %c0_i32 = arith.constant 0 : i32
    %c0_i32_0 = arith.constant 0 : i32
    return %arg0, %c0_i32 : i32, i32
  }
}

</mosaic_0001>

<bundles_post_ra>
// kernel: tpu_custom_call.1
= control target key start
LH: loop header
LB: loop body
LE: loop exit
PB: predicated region body
PF: predicated region fallthrough
CT: control target
= control target key end

     0   :  { %12 = vsyncpa [#allocation4], 0  ;;  %s925_s0 = inlined_call_operand.hbm [shape: f32[8,128], index: 0, kind: input, shape index: {}]   ;;  %s926_s1 = inlined_call_operand.hbm [shape: f32[128,128], index: 1, kind: input, shape index: {}]   ;;  %s927_s2 = inlined_call_operand.vmem [shape: f32[1,128], index: 2, kind: input, shape index: {}]   ;;  %s928_s3 = inlined_call_operand.hbm [shape: f32[128,128], index: 3, kind: input, shape index: {}]   ;;  %s929_s4 = inlined_call_operand.vmem [shape: f32[1,128], index: 4, kind: input, shape index: {}]   ;;  %s930_s5 = inlined_call_operand.hbm [shape: f32[128,128], index: 5, kind: input, shape index: {}]   ;;  %s931_s6 = inlined_call_operand.vmem [shape: f32[1,128], index: 6, kind: input, shape index: {}]   ;;  %s932_s7 = inlined_call_operand.hbm [shape: f32[8,128], index: 7, kind: output, shape index: {}]  }
   0x1   :  { %13 = vsyncpa [#allocation7], 0 }
   0x2   :  { %14 = vsyncpa [#allocation10], 0 }
   0x3   :  { %15 = vsyncpa [#allocation5], 0  ;;  %s767_s24 = smov [#allocation6]   ;;  %s649_s28 = scalar_lea.hbm %s926_s1, 2048 }
   0x4   :  { %s31_s25 = sshll.u32 %s767_s24, 4  ;;  %p650_p0 = scmp.ne.s32.totalorder %s926_s1, %s649_s28  ;;  %s32_s25 = int_to_ptr.vmem [resolvable:$true] %s31_s25 }
   0x5   :  { %p653_p1 = scmp.lt.u32.totalorder %s649_s28, %s926_s1 }
   0x7   :  { %p655_p2 = pnand %p653_p1, %p650_p0 }
   0x9   :  { %658 = shalt.err (!%p655_p2)
}
   0xa   :  { %s659_s10 = scalar_lea.vmem %s32_s25, 2048  ;;  %p664_p4 = scmp.lt.s32.totalorder %s32_s25, %s32_s25 }
   0xb   :  { %p660_p3 = scmp.ne.s32.totalorder %s32_s25, %s659_s10  ;;  %p665_p5 = scmp.lt.s32.totalorder %s659_s10, %s659_s10 }
   0xd   :  { %p666_p6 = por %p665_p5, %p664_p4 }
   0xf   :  { %p667_p7 = pnand %p666_p6, %p660_p3 }
  0x11   :  { %670 = shalt.err (!%p667_p7)
}
  0x12   :  { %s768_s11 = smov 128   ;;  %s769_s12 = smov 8  }
  0x13   :  { %37 = dma.hbm_to_vmem [thread:$0]  %s926_s1, 2048, %s32_s25, [#allocation7], %s768_s11, %s768_s11, %s769_s12  }
  0x14   :  { %s770_s15 = smov [#allocation3]   ;;  %s771_s17 = smov [#allocation8]  }
  0x15   :  { %s22_s16 = sshll.u32 %s770_s15, 4  ;;  %s45_s18 = sshll.u32 %s771_s17, 4  ;;  %s23_s16 = int_to_ptr.vmem [resolvable:$true] %s22_s16  ;;  %s46_s18 = int_to_ptr.vmem [resolvable:$true] %s45_s18 }
  0x16   :  { %s671_s21 = scalar_lea.hbm %s925_s0, 128 }
  0x17   :  { %p672_p8 = scmp.ne.s32.totalorder %s925_s0, %s671_s21  ;;  %p675_p9 = scmp.lt.u32.totalorder %s671_s21, %s925_s0 }
  0x19   :  { %p677_p10 = pnand %p675_p9, %p672_p8 }
  0x1b   :  { %680 = shalt.err (!%p677_p10)
}
  0x1c   :  { %s681_s1 = scalar_lea.vmem %s23_s16, 128  ;;  %p686_p12 = scmp.lt.s32.totalorder %s23_s16, %s23_s16 }
  0x1d   :  { %p682_p11 = scmp.ne.s32.totalorder %s23_s16, %s681_s1  ;;  %p687_p13 = scmp.lt.s32.totalorder %s681_s1, %s681_s1 }
  0x1f   :  { %p688_p0 = por %p687_p13, %p686_p12 }
  0x21   :  { %p689_p1 = pnand %p688_p0, %p682_p11 }
  0x23   :  { %692 = shalt.err (!%p689_p1)
}
  0x24   :  { %25 = dma.hbm_to_vmem [thread:$0]  %s925_s0, 128, %s23_s16, [#allocation4]  }
  0x25   :  { %s693_s30 = scalar_lea.hbm %s928_s3, 2048 }
  0x26   :  { %p694_p2 = scmp.ne.s32.totalorder %s928_s3, %s693_s30  ;;  %p697_p3 = scmp.lt.u32.totalorder %s693_s30, %s928_s3 }
  0x28   :  { %p699_p4 = pnand %p697_p3, %p694_p2 }
  0x2a   :  { %702 = shalt.err (!%p699_p4)
}
  0x2b   :  { %s703_s14 = scalar_lea.vmem %s46_s18, 2048  ;;  %p708_p6 = scmp.lt.s32.totalorder %s46_s18, %s46_s18 }
  0x2c   :  { %p704_p5 = scmp.ne.s32.totalorder %s46_s18, %s703_s14  ;;  %p709_p7 = scmp.lt.s32.totalorder %s703_s14, %s703_s14 }
  0x2e   :  { %p710_p8 = por %p709_p7, %p708_p6 }
  0x30   :  { %p711_p9 = pnand %p710_p8, %p704_p5 }
  0x32   :  { %714 = shalt.err (!%p711_p9)
}
  0x33   :  { %51 = dma.hbm_to_vmem [thread:$0]  %s928_s3, 2048, %s46_s18, [#allocation7], %s768_s11, %s768_s11, %s769_s12  }
  0x34   :  { %s772_s16 = smov [#allocation9]   ;;  %s715_s21 = scalar_lea.hbm %s930_s5, 2048 }
  0x35   :  { %s59_s17 = sshll.u32 %s772_s16, 4  ;;  %p716_p10 = scmp.ne.s32.totalorder %s930_s5, %s715_s21  ;;  %s60_s17 = int_to_ptr.vmem [resolvable:$true] %s59_s17 }
  0x36   :  { %p719_p11 = scmp.lt.u32.totalorder %s715_s21, %s930_s5 }
  0x38   :  { %p721_p12 = pnand %p719_p11, %p716_p10 }
  0x3a   :  { %724 = shalt.err (!%p721_p12)
}
  0x3b   :  { %s725_s1 = scalar_lea.vmem %s60_s17, 2048  ;;  %p730_p0 = scmp.lt.s32.totalorder %s60_s17, %s60_s17 }
  0x3c   :  { %p726_p13 = scmp.ne.s32.totalorder %s60_s17, %s725_s1  ;;  %p731_p1 = scmp.lt.s32.totalorder %s725_s1, %s725_s1 }
  0x3e   :  { %p732_p2 = por %p731_p1, %p730_p0 }
  0x40   :  { %p733_p3 = pnand %p732_p2, %p726_p13 }
  0x42   :  { %736 = shalt.err (!%p733_p3)
}
  0x43   :  { %65 = dma.hbm_to_vmem [thread:$0]  %s930_s5, 2048, %s60_s17, [#allocation10], %s768_s11, %s768_s11, %s769_s12  }
  0x44   :  { %759 = dma.done.wait [#allocation4], 128  }
  0x45   :  { %760 = vsyncadd [#allocation4], 4294967168 }
  0x46   :  { %761 = dma.done.wait [#allocation7], 4096  }
  0x47   :  { %762 = vsyncadd [#allocation7], 4294963200 }
  0x48   :  { %763 = dma.done.wait [#allocation10], 2048  }
  0x49   :  { %764 = vsyncadd [#allocation10], 4294965248  ;;  %v773_v0 = vmov 0.0|0.0   ;;  %vm774_vm0 = vmmov 0   ;;  %v775_v1 = vmov 0.0   ;;  %v87_v2 = vld [vmem:[#allocation6] sm:$0xff] }
  0x4a   :  { %563 = vmatprep.subr.bf16.mxu0 %v773_v0  ;;  %490 = vmatprep.mubr.msk.f32.mxu0 %vm774_vm0, %v775_v1  ;;  %v88_v3 = vld [vmem:[#allocation6 + $0x8] sm:$0xff]  ;;  %v89_v4 = vld [vmem:[#allocation6 + $0x10] sm:$0xff]  ;;  %v90_v6 = vld [vmem:[#allocation6 + $0x18] sm:$0xff] }
  0x4b   :  { %587 = vmatprep.subr.bf16.mxu1 %v773_v0  ;;  %525 = vmatprep.mubr.msk.f32.mxu1 %vm774_vm0, %v775_v1  ;;  %v564_v5 = vpack.c.bf16 %v88_v3, %v87_v2  ;;  %v567_v7 = vpack.c.bf16 %v90_v6, %v89_v4  ;;  %v91_v8 = vld [vmem:[#allocation6 + $0x20] sm:$0xff]  ;;  %v92_v9 = vld [vmem:[#allocation6 + $0x28] sm:$0xff]  ;;  %v191_v12 = vld [vmem:[#allocation8 + $0x10] sm:$0xff] }
  0x4c   :  { %v189_v10 = vld [vmem:[#allocation8] sm:$0xff]  ;;  %v190_v11 = vld [vmem:[#allocation8 + $0x8] sm:$0xff]  ;;  %v192_v13 = vld [vmem:[#allocation8 + $0x18] sm:$0xff]  ;;  %v570_v14 = vpack.c.bf16 %v92_v9, %v91_v8 }
  0x4d   :  { %565 = vmatpush3.bf16.msra.mxu0 %v564_v5  ;;  %v588_v15 = vpack.c.bf16 %v190_v11, %v189_v10  ;;  %v93_v16 = vld [vmem:[#allocation6 + $0x30] sm:$0xff]  ;;  %v94_v17 = vld [vmem:[#allocation6 + $0x38] sm:$0xff]  ;;  %v591_v18 = vpack.c.bf16 %v192_v13, %v191_v12  ;;  %v193_v19 = vld [vmem:[#allocation8 + $0x20] sm:$0xff] }
  0x4e   :  { %566 = vmatprep.subr.bf16.mxu0 %v773_v0  ;;  %v194_v20 = vld [vmem:[#allocation8 + $0x28] sm:$0xff]  ;;  %v573_v21 = vpack.c.bf16 %v94_v17, %v93_v16  ;;  %v95_v22 = vld [vmem:[#allocation6 + $0x40] sm:$0xff]  ;;  %v195_v25 = vld [vmem:[#allocation8 + $0x30] sm:$0xff] }
  0x4f   :  { %589 = vmatpush3.bf16.msra.mxu1 %v588_v15  ;;  %v96_v23 = vld [vmem:[#allocation6 + $0x48] sm:$0xff]  ;;  %v594_v24 = vpack.c.bf16 %v194_v20, %v193_v19  ;;  %v196_v26 = vld [vmem:[#allocation8 + $0x38] sm:$0xff]  ;;  %v97_v28 = vld [vmem:[#allocation6 + $0x50] sm:$0xff] }
  0x50   :  { %590 = vmatprep.subr.bf16.mxu1 %v773_v0  ;;  %v576_v27 = vpack.c.bf16 %v96_v23, %v95_v22  ;;  %v98_v29 = vld [vmem:[#allocation6 + $0x58] sm:$0xff]  ;;  %v597_v30 = vpack.c.bf16 %v196_v26, %v195_v25  ;;  %v197_v31 = vld [vmem:[#allocation8 + $0x40] sm:$0xff]  ;;  %v198_v32 = vld [vmem:[#allocation8 + $0x48] sm:$0xff] }
  0x51   :  { %568 = vmatpush3.bf16.msra.mxu0 %v567_v7  ;;  %v579_v33 = vpack.c.bf16 %v98_v29, %v97_v28  ;;  %v99_v34 = vld [vmem:[#allocation6 + $0x60] sm:$0xff]  ;;  %v100_v35 = vld [vmem:[#allocation6 + $0x68] sm:$0xff]  ;;  %v600_v36 = vpack.c.bf16 %v198_v32, %v197_v31  ;;  %v199_v37 = vld [vmem:[#allocation8 + $0x50] sm:$0xff] }
  0x52   :  { %569 = vmatprep.subr.bf16.mxu0 %v773_v0  ;;  %v200_v38 = vld [vmem:[#allocation8 + $0x58] sm:$0xff]  ;;  %v582_v39 = vpack.c.bf16 %v100_v35, %v99_v34  ;;  %v101_v40 = vld [vmem:[#allocation6 + $0x70] sm:$0xff]  ;;  %v201_v45 = vld [vmem:[#allocation8 + $0x60] sm:$0xff] }
  0x53   :  { %592 = vmatpush3.bf16.msra.mxu1 %v591_v18  ;;  %v102_v41 = vld [vmem:[#allocation6 + $0x78] sm:$0xff]  ;;  %v603_v42 = vpack.c.bf16 %v200_v38, %v199_v37  ;;  %v202_v46 = vld [vmem:[#allocation8 + $0x68] sm:$0xff]  ;;  %v203_v48 = vld [vmem:[#allocation8 + $0x70] sm:$0xff] }
  0x54   :  { %593 = vmatprep.subr.bf16.mxu1 %v773_v0  ;;  %v585_v43 = vpack.c.bf16 %v102_v41, %v101_v40  ;;  %v86_v44 = vld [vmem:[#allocation3] sm:$0xff]  ;;  %v606_v47 = vpack.c.bf16 %v202_v46, %v201_v45  ;;  %v284_v51 = vld [vmem:[#allocation9] sm:$0xff]  ;;  %v285_v52 = vld [vmem:[#allocation9 + $0x8] sm:$0xff] }
  0x55   :  { %571 = vmatpush3.bf16.msra.mxu0 %v570_v14  ;;  %v204_v49 = vld [vmem:[#allocation8 + $0x78] sm:$0xff]  ;;  %v286_v53 = vld [vmem:[#allocation9 + $0x10] sm:$0xff]  ;;  %v612_v54 = vpack.c.bf16 %v285_v52, %v284_v51  ;;  %v288_v57 = vld [vmem:[#allocation9 + $0x20] sm:$0xff] }
  0x56   :  { %572 = vmatprep.subr.bf16.mxu0 %v773_v0  ;;  %v609_v50 = vpack.c.bf16 %v204_v49, %v203_v48  ;;  %v287_v55 = vld [vmem:[#allocation9 + $0x18] sm:$0xff]  ;;  %v289_v58 = vld [vmem:[#allocation9 + $0x28] sm:$0xff]  ;;  %v290_v60 = vld [vmem:[#allocation9 + $0x30] sm:$0xff] }
  0x57   :  { %595 = vmatpush3.bf16.msra.mxu1 %v594_v24  ;;  %v615_v56 = vpack.c.bf16 %v287_v55, %v286_v53  ;;  %v618_v59 = vpack.c.bf16 %v289_v58, %v288_v57  ;;  %v291_v61 = vld [vmem:[#allocation9 + $0x38] sm:$0xff]  ;;  %v292_v63 = vld [vmem:[#allocation9 + $0x40] sm:$0xff]  ;;  %v294_v3 = vld [vmem:[#allocation9 + $0x50] sm:$0xff] }
  0x58   :  { %596 = vmatprep.subr.bf16.mxu1 %v773_v0  ;;  %v621_v62 = vpack.c.bf16 %v291_v61, %v290_v60  ;;  %v295_v4 = vld [vmem:[#allocation9 + $0x58] sm:$0xff]  ;;  %v296_v12 = vld [vmem:[#allocation9 + $0x60] sm:$0xff]  ;;  %v297_v13 = vld [vmem:[#allocation9 + $0x68] sm:$0xff] }
  0x59   :  { %574 = vmatpush3.bf16.msra.mxu0 %v573_v21  ;;  %v627_v5 = vpack.c.bf16 %v295_v4, %v294_v3  ;;  %v404_v6 = vld [vmem:[%s927_s2] ss:$0 sm:$0xff]  ;;  %v630_v14 = vpack.c.bf16 %v297_v13, %v296_v12  ;;  %v298_v15 = vld [vmem:[#allocation9 + $0x70] sm:$0xff] }
  0x5a   :  { %575 = vmatprep.subr.bf16.mxu0 %v773_v0  ;;  %v299_v16 = vld [vmem:[#allocation9 + $0x78] sm:$0xff] }
  0x5b   :  { %598 = vmatpush3.bf16.msra.mxu1 %v597_v30  ;;  %v633_v17 = vpack.c.bf16 %v299_v16, %v298_v15  ;;  %v405_v18 = vld [vmem:[%s929_s4] ss:$0 sm:$0xff]  ;;  %s776_s4 = smov [#allocation11]  }
  0x5c   :  { %599 = vmatprep.subr.bf16.mxu1 %v773_v0  ;;  %v406_v24 = vld [vmem:[%s931_s6] ss:$0 sm:$0xff]  ;;  %s393_s28 = sshll.u32 %s776_s4, 4  ;;  %s394_s28 = int_to_ptr.vmem [resolvable:$true] %s393_s28 }
  0x5d   :  { %577 = vmatpush3.bf16.msra.mxu0 %v576_v27  ;;  %s737_s29 = scalar_lea.vmem %s394_s28, 128  ;;  %p742_p5 = scmp.lt.s32.totalorder %s394_s28, %s394_s28 }
  0x5e   :  { %578 = vmatprep.subr.bf16.mxu0 %v773_v0  ;;  %p738_p4 = scmp.ne.s32.totalorder %s394_s28, %s737_s29  ;;  %p743_p6 = scmp.lt.s32.totalorder %s737_s29, %s737_s29 }
  0x5f   :  { %601 = vmatpush3.bf16.msra.mxu1 %v600_v36 }
  0x60   :  { %602 = vmatprep.subr.bf16.mxu1 %v773_v0  ;;  %p744_p7 = por %p743_p6, %p742_p5 }
  0x61   :  { %580 = vmatpush3.bf16.msra.mxu0 %v579_v33 }
  0x62   :  { %581 = vmatprep.subr.bf16.mxu0 %v773_v0  ;;  %p745_p8 = pnand %p744_p7, %p738_p4 }
  0x63   :  { %604 = vmatpush3.bf16.msra.mxu1 %v603_v42 }
  0x64   :  { %605 = vmatprep.subr.bf16.mxu1 %v773_v0 }
  0x65   :  { %583 = vmatpush3.bf16.msra.mxu0 %v582_v39 }
  0x66   :  { %584 = vmatprep.subr.bf16.mxu0 %v773_v0 }
  0x67   :  { %607 = vmatpush3.bf16.msra.mxu1 %v606_v47 }
  0x68   :  { %608 = vmatprep.subr.bf16.mxu1 %v773_v0 }
  0x69   :  { %586 = vmatpush3.bf16.msra.mxu0 %v585_v43 }
  0x6a   :  { %611 = vmatprep.subr.bf16.mxu0 %v773_v0 }
  0x6b   :  { %610 = vmatpush3.bf16.msra.mxu1 %v609_v50 }
  0x6c   :  { %491 = vmatmul.mubr.f32.vlgmr.msra.gmra.mrb[0].mxu0 %v86_v44 }
  0x6d   :  { %560 = vmatprep.mubr.msk.f32.mxu0 %vm774_vm0, %v775_v1  ;;  %613 = vmatpush3.bf16.msra.mxu0 %v612_v54  ;;  %v293_v1 = vld [vmem:[#allocation9 + $0x48] sm:$0xff] }
  0x6e   :  { %614 = vmatprep.subr.bf16.mxu0 %v773_v0  ;;  %v624_v2 = vpack.c.bf16 %v293_v1, %v292_v63 }
  0x71   :  { %616 = vmatpush3.bf16.msra.mxu0 %v615_v56 }
  0x72   :  { %617 = vmatprep.subr.bf16.mxu0 %v773_v0 }
  0x75   :  { %619 = vmatpush3.bf16.msra.mxu0 %v618_v59 }
  0x76   :  { %620 = vmatprep.subr.bf16.mxu0 %v773_v0 }
  0x79   :  { %622 = vmatpush3.bf16.msra.mxu0 %v621_v62 }
  0x7a   :  { %623 = vmatprep.subr.bf16.mxu0 %v773_v0 }
  0x7d   :  { %625 = vmatpush3.bf16.msra.mxu0 %v624_v2 }
  0x7e   :  { %626 = vmatprep.subr.bf16.mxu0 %v773_v0 }
  0x81   :  { %628 = vmatpush3.bf16.msra.mxu0 %v627_v5 }
  0x82   :  { %629 = vmatprep.subr.bf16.mxu0 %v773_v0 }
  0x85   :  { %631 = vmatpush3.bf16.msra.mxu0 %v630_v14 }
  0x86   :  { %632 = vmatprep.subr.bf16.mxu0 %v773_v0 }
  0x89   :  { %634 = vmatpush3.bf16.msra.mxu0 %v633_v17 }
 0x13f   :  { %v169_v7 = vpop.f32.mrb[0].mxu0 }
 0x140   :  { %v186_v8 = vadd.f32 %v404_v6, %v169_v7  ;;  %v492_v9 = vpop.f32.mrb[1].mxu0 }
 0x142   :  { %v187_v10 = vmul.f32 0.1, %v186_v8 }
 0x144   :  { %v188_v11 = vmax.f32 %v186_v8, %v187_v10 }
 0x146   :  { %526 = vmatmul.mubr.f32.vlgmr.msra.gmra.mrb[0].mxu1 %v188_v11 }
 0x219   :  { %v278_v19 = vpop.f32.mrb[0].mxu1 }
 0x21a   :  { %v279_v20 = vadd.f32 %v405_v18, %v278_v19  ;;  %v527_v21 = vpop.f32.mrb[1].mxu1 }
 0x21c   :  { %v282_v22 = vmul.f32 0.1, %v279_v20 }
 0x21e   :  { %v283_v23 = vmax.f32 %v279_v20, %v282_v22 }
 0x220   :  { %561 = vmatmul.mubr.f32.vlgmr.msra.gmra.mrb[2].mxu0 %v283_v23 }
 0x2f3   :  { %v373_v25 = vpop.f32.mrb[2].mxu0 }
 0x2f4   :  { %v374_v0 = vadd.f32 %v406_v24, %v373_v25  ;;  %v562_v26 = vpop.f32.mrb[3].mxu0 }
 0x2f6   :  { %377 = vmax.xlane.f32.xlu0 %v374_v0 }
 0x383   :  { %v378_v27 = vpop.xlane.xlu0 %377 }
 0x384   :  { %v379_v28 = vsub.f32 %v374_v0, %v378_v27 }
 0x386   :  { %v380_v29 = vmul.f32 1.442695, %v379_v28 }
 0x388   :  { %645 = vpow2.f32 %v380_v29 }
 0x392   :  { %v646_v30 = vpop.eup %645 }
 0x393   :  { %382 = vadd.xlane.f32.xlu0 %v646_v30 }
 0x420   :  { %v383_v31 = vpop.xlane.xlu0 %382 }
 0x421   :  { %647 = vrcp.f32 %v383_v31 }
 0x42b   :  { %v648_v32 = vpop.eup %647 }
 0x42c   :  { %v385_v33 = vmul.f32 %v648_v32, %v646_v30 }
 0x42e   :  { %386 = vst [vmem:[#allocation11] sm:$0xff] %v385_v33 }
 0x42f   :  { %748 = shalt.err (!%p745_p8)
}
 0x430   :  { %s749_s8 = scalar_lea.hbm %s932_s7, 128 }
 0x431   :  { %p750_p9 = scmp.ne.s32.totalorder %s932_s7, %s749_s8  ;;  %p753_p10 = scmp.lt.u32.totalorder %s749_s8, %s932_s7 }
 0x433   :  { %p755_p11 = pnand %p753_p10, %p750_p9 }
 0x435   :  { %758 = shalt.err (!%p755_p11)
}
 0x436   :  { %396 = dma.vmem_to_hbm [thread:$0]  %s394_s28, 128, %s932_s7, [#allocation5]  }
 0x437   :  { %765 = dma.done.wait [#allocation5], 128  }
 0x438   :  { %766 = vsyncadd [#allocation5], 4294967168 }
 0x439   :  { %400 = vsyncpa [#allocation4], 1 }
 0x43a   :  { %401 = vsyncpa [#allocation7], 1 }
 0x43b   :  { %402 = vsyncpa [#allocation10], 1 }
 0x43c   :  { %403 = vsyncpa [#allocation5], 1 }

</bundles_post_ra>
